<compile_context>
chip_gen: v5e
topology: v5e:2x2
jax: 0.10.0
libtpu: 0.0.40
codegen_flags: <defaults>
</compile_context>

<pallas_src>
import math
import numpy as np
import jax
import jax.numpy as jnp
from jax.experimental import pallas as pl
from jax.experimental.pallas import tpu as pltpu


# ------------------------- model / graph sizes -------------------------
IN_DIM = 4        # in_dim
H_DIM = 128       # h_dim (lane-friendly; torch default is 256)
OUT_DIM = 1       # out_dim
NUM_BASES = 1     # num_bases
NUM_RELS = 3      # len(type_index_dic) -- synthetic dict with 3 relation types
N_NODES = 16
N_EDGES = 32
N_GRAPHS = 4      # batched graphs along the parallel grid axis
LANE = 128        # padded lane width for the (E, out_dim) result


# ------------------------- parameter setup (glue) -------------------------
def xavier_uniform(key, shape, gain):
    # torch fan computation for a 3-D tensor (num_bases, in, out):
    #   fan_in = shape[1]*prod(shape[2:]), fan_out = shape[0]*prod(shape[2:])
    receptive = int(np.prod(shape[2:])) if len(shape) > 2 else 1
    fan_in = shape[1] * receptive
    fan_out = shape[0] * receptive
    bound = gain * math.sqrt(6.0 / (fan_in + fan_out))
    return jax.random.uniform(key, shape, jnp.float32, -bound, bound)


def build_rel_weight(weight, w_comp, out_feat, in_feat, num_rels, num_bases):
    # exactly mirrors: weight.view(out, bases, in); matmul(w_comp, .); .view(rels, out, in)
    w = weight.reshape(out_feat, num_bases, in_feat)          # (O, B, I)
    w = jnp.matmul(w_comp, w)                                 # (O, R, I) broadcast batch matmul
    return w.reshape(num_rels, out_feat, in_feat)             # (R, O, I)


# ------------------------- Pallas kernel (one graph per grid step) -------------------------
def rgcn_kernel(h_ref, a_ref, s_ref, reloh_ref, wcin_ref, wsth0_ref, woutc_ref, out_ref):
    """Per-graph block, all operands VMEM-resident.

    h_ref     : (N, in_dim)        node features 'h' of this graph
    a_ref     : (R, N, N)          per-relation aggregation operators A_r[v,u]
    s_ref     : (E, N)             one-hot src-gather matrix (output layer only)
    reloh_ref : (E, R)             one-hot relation selector per edge
    wcin_ref  : (in_dim, R*h_dim)  pre-transposed, relation-concatenated W_in  (grid-resident)
    wsth0_ref : (R*h_dim, h_dim)   vertically stacked W_h0[r]^T                (grid-resident)
    woutc_ref : (h_dim, R)         output-layer weight vectors as columns      (grid-resident)
    out_ref   : (E, LANE)          padded per-edge result (wrapper slices [..., :1])
    """
    num_rels = a_ref.shape[0]
    h_dim = wsth0_ref.shape[1]

    # ---- layer "in": weight matmul on node rows, then per-relation aggregation.
    #      (lane slices of y are 128-aligned; concat of 4-wide Z_r pieces would not be)
    y = jnp.dot(h_ref[...], wcin_ref[...], preferred_element_type=jnp.float32)   # (N, R*H)
    agg = jnp.dot(a_ref[0], y[:, 0:h_dim], preferred_element_type=jnp.float32)
    for r in range(1, num_rels):
        agg = agg + jnp.dot(a_ref[r], y[:, r * h_dim:(r + 1) * h_dim],
                            preferred_element_type=jnp.float32)
    h2 = jnp.maximum(agg, 0.0)

    # ---- layer "h0": reassociated -- aggregate first (128-aligned lane concat),
    #      then ONE stacked weight matmul with K = R*h_dim.
    z = jnp.concatenate(
        [jnp.dot(a_ref[r], h2, preferred_element_type=jnp.float32)
         for r in range(num_rels)], axis=-1)                                      # (N, R*H)
    h2 = jnp.maximum(
        jnp.dot(z, wsth0_ref[...], preferred_element_type=jnp.float32), 0.0)      # (N, H)

    # ---- layer "out": per-edge result, no reduction.
    p = jnp.dot(h2, woutc_ref[...], preferred_element_type=jnp.float32)           # (N, R)
    pe = jnp.dot(s_ref[...], p, preferred_element_type=jnp.float32)               # (E, R)
    red = jnp.sum(pe * reloh_ref[...], axis=-1, keepdims=True)                    # (E, 1)
    out_ref[...] = jnp.broadcast_to(red, out_ref.shape)                           # lane-dense store


# ------------------------- jitted wrapper (glue + kernel in one executable) -------------------------
@jax.jit
def regression_x1_forward(h, src, dst, edge_type, w_in, w_h0, w_out):
    """h: (B,N,in); src/dst/edge_type: (B,E); weights: (R,out,in). Returns (B,E,out_dim)."""
    b, n, in_dim = h.shape
    e = src.shape[1]
    r, h_dim, _ = w_in.shape
    assert w_out.shape[1] == OUT_DIM == 1, "output layer assumes out_dim == 1"

    # ---- glue (fused by jit into the same executable as the pallas_call) ----
    src_oh = jax.nn.one_hot(src, n, dtype=jnp.float32)             # (B, E, N)
    dst_oh = jax.nn.one_hot(dst, n, dtype=jnp.float32)             # (B, E, N)
    rel_oh = jax.nn.one_hot(edge_type, r, dtype=jnp.float32)       # (B, E, R)
    # per-relation aggregation operator: A[b, r, v, u] = #edges u->v with relation r
    a_ops = jnp.einsum('ber,bev,beu->brvu', rel_oh, dst_oh, src_oh)  # (B, R, N, N)
    # layer "in": pre-transposed, relation-concatenated weight: (in, R*H)
    wc_in = w_in.reshape(r * h_dim, in_dim).T
    # layer "h0": vertically stacked W_r^T: (R*H, H)
    wst_h0 = w_h0.transpose(0, 2, 1).reshape(r * h_dim, h_dim)
    # layer "out": weight vectors as columns: (H, R)
    w_out_cat = w_out[:, 0, :].T

    flops_per_graph = (2 * n * in_dim * r * h_dim + 2 * r * n * n * h_dim   # layer "in"
                       + 2 * r * n * n * h_dim + 2 * n * (r * h_dim) * h_dim  # layer "h0"
                       + 2 * n * h_dim * r + 2 * e * n * r + 2 * e * r)       # layer "out"
    bytes_accessed = 4 * (h.size + a_ops.size + src_oh.size + rel_oh.size
                          + wc_in.size + wst_h0.size + w_out_cat.size + b * e * LANE)

    out_padded = pl.pallas_call(
        rgcn_kernel,
        out_shape=jax.ShapeDtypeStruct((b, e, LANE), jnp.float32),
        grid_spec=pltpu.PrefetchScalarGridSpec(
            num_scalar_prefetch=0,
            grid=(b,),
            in_specs=[
                # per-graph blocks (leading dim squeezed)
                pl.BlockSpec((None, n, in_dim), lambda i: (i, 0, 0)),
                pl.BlockSpec((None, r, n, n), lambda i: (i, 0, 0, 0)),
                pl.BlockSpec((None, e, n), lambda i: (i, 0, 0)),
                pl.BlockSpec((None, e, r), lambda i: (i, 0, 0)),
                # weights: constant index maps -> stay resident across grid steps
                pl.BlockSpec((in_dim, r * h_dim), lambda i: (0, 0)),
                pl.BlockSpec((r * h_dim, h_dim), lambda i: (0, 0)),
                pl.BlockSpec((h_dim, r), lambda i: (0, 0)),
            ],
            out_specs=pl.BlockSpec((None, e, LANE), lambda i: (i, 0, 0)),
        ),
        compiler_params=pltpu.CompilerParams(dimension_semantics=("parallel",)),
        cost_estimate=pl.CostEstimate(flops=b * flops_per_graph, transcendentals=0,
                                      bytes_accessed=bytes_accessed),
    )(h, a_ops, src_oh, rel_oh, wc_in, wst_h0, w_out_cat)

    return out_padded[..., :OUT_DIM]


# ------------------------- pure-JAX reference -------------------------
def _reference_forward_single(h, src, dst, edge_type, w_in, w_h0, w_out):
    n = h.shape[0]

    def layer(x_nodes, w, act):
        xe = x_nodes[src]                                    # gather src features
        msg = jnp.einsum('eoi,ei->eo', w[edge_type], xe)     # per-edge F.linear
        if not act:
            return msg
        agg = jnp.zeros((n, w.shape[1]), jnp.float32).at[dst].add(msg)
        return jnp.maximum(agg, 0.0)

    h2 = layer(h, w_in, True)
    h2 = layer(h2, w_h0, True)
    return layer(h2, w_out, False)


reference_forward = jax.vmap(_reference_forward_single,
                             in_axes=(0, 0, 0, 0, None, None, None))


# ------------------------- main -------------------------
if __name__ == "__main__":
    key = jax.random.PRNGKey(0)
    kh, ks, kd, kt, k1, k2, k3, k4, k5, k6 = jax.random.split(key, 10)
    gain = math.sqrt(2.0)  # calculate_gain('relu')

    # batch of graphs
    h = jax.random.normal(kh, (N_GRAPHS, N_NODES, IN_DIM), jnp.float32)   # ndata['h']
    src = jax.random.randint(ks, (N_GRAPHS, N_EDGES), 0, N_NODES)
    dst = jax.random.randint(kd, (N_GRAPHS, N_EDGES), 0, N_NODES)
    edge_type = jax.random.randint(kt, (N_GRAPHS, N_EDGES), 0, NUM_RELS)  # edata['we']

    # parameters (deterministic synthetic init, shapes per __init__)
    weight_in = xavier_uniform(k1, (NUM_BASES, IN_DIM, H_DIM), gain)
    w_comp_in = xavier_uniform(k2, (NUM_RELS, NUM_BASES), gain)
    weight_h0 = xavier_uniform(k3, (NUM_BASES, H_DIM, H_DIM), gain)
    w_comp_h0 = xavier_uniform(k4, (NUM_RELS, NUM_BASES), gain)
    weight_out = xavier_uniform(k5, (NUM_BASES, H_DIM, OUT_DIM), gain)
    w_comp_out = xavier_uniform(k6, (NUM_RELS, NUM_BASES), gain)

    # relation-specific weights, built exactly like the torch forward
    w_in = build_rel_weight(weight_in, w_comp_in, H_DIM, IN_DIM, NUM_RELS, NUM_BASES)
    w_h0 = build_rel_weight(weight_h0, w_comp_h0, H_DIM, H_DIM, NUM_RELS, NUM_BASES)
    w_out = build_rel_weight(weight_out, w_comp_out, OUT_DIM, H_DIM, NUM_RELS, NUM_BASES)

    r_kernel = regression_x1_forward(h, src, dst, edge_type, w_in, w_h0, w_out)
    r_kernel = jax.block_until_ready(r_kernel)

    r_ref = reference_forward(h, src, dst, edge_type, w_in, w_h0, w_out)
    np.testing.assert_allclose(np.asarray(r_kernel), np.asarray(r_ref),
                               rtol=1e-4, atol=1e-4)

    print("KERNEL_OK")
</pallas_src>

<mosaic_0001>
module attributes {stable_mosaic.version = 11 : i64} {
  func.func @rgcn_kernel(%arg0: i32, %arg1: memref<1x16x4xf32, #tpu.memory_space<vmem>>, %arg2: memref<1x3x16x16xf32, #tpu.memory_space<vmem>>, %arg3: memref<1x32x16xf32, #tpu.memory_space<vmem>>, %arg4: memref<1x32x3xf32, #tpu.memory_space<vmem>>, %arg5: memref<4x384xf32, #tpu.memory_space<vmem>>, %arg6: memref<384x128xf32, #tpu.memory_space<vmem>>, %arg7: memref<128x3xf32, #tpu.memory_space<vmem>>, %arg8: memref<1x32x128xf32, #tpu.memory_space<vmem>>) attributes {dimension_semantics = [#tpu.dimension_semantics<parallel>], iteration_bounds = array<i64: 4>, scalar_prefetch = 0 : i64, scratch_operands = 0 : i64, tpu.core_type = #tpu.core_type<tc>, window_params = [{transform_indices = @transform_0, window_bounds = array<i64: 1, 16, 4>}, {transform_indices = @transform_1, window_bounds = array<i64: 1, 3, 16, 16>}, {transform_indices = @transform_2, window_bounds = array<i64: 1, 32, 16>}, {transform_indices = @transform_3, window_bounds = array<i64: 1, 32, 3>}, {pipeline_mode = #tpu.pipeline_mode<synchronous>, transform_indices = @transform_4, window_bounds = array<i64: 4, 384>}, {pipeline_mode = #tpu.pipeline_mode<synchronous>, transform_indices = @transform_5, window_bounds = array<i64: 384, 128>}, {pipeline_mode = #tpu.pipeline_mode<synchronous>, transform_indices = @transform_6, window_bounds = array<i64: 128, 3>}, {transform_indices = @transform_7, window_bounds = array<i64: 1, 32, 128>}]} {
    %c0 = arith.constant 0 : index
    %c0_0 = arith.constant 0 : index
    %c0_1 = arith.constant 0 : index
    %0 = vector.load %arg1[%c0, %c0_0, %c0_1] : memref<1x16x4xf32, #tpu.memory_space<vmem>>, vector<1x16x4xf32>
    %1 = vector.shape_cast %0 : vector<1x16x4xf32> to vector<16x4xf32>
    %c0_2 = arith.constant 0 : index
    %c0_3 = arith.constant 0 : index
    %2 = vector.load %arg5[%c0_2, %c0_3] : memref<4x384xf32, #tpu.memory_space<vmem>>, vector<4x384xf32>
    %cst = arith.constant dense<0.000000e+00> : vector<16x384xf32>
    %3 = tpu.matmul %1, %2, %cst {dimension_numbers = #tpu.dot_dimension_numbers<[1], [0], [0], [1], [0, 0, 1, 1], [], []>} : vector<16x4xf32>, vector<4x384xf32>, vector<16x384xf32> -> vector<16x384xf32>
    %c0_4 = arith.constant 0 : index
    %c0_5 = arith.constant 0 : index
    %c0_6 = arith.constant 0 : index
    %c0_7 = arith.constant 0 : index
    %4 = vector.load %arg2[%c0_4, %c0_5, %c0_6, %c0_7] : memref<1x3x16x16xf32, #tpu.memory_space<vmem>>, vector<1x1x16x16xf32>
    %5 = vector.shape_cast %4 : vector<1x1x16x16xf32> to vector<16x16xf32>
    %6 = vector.extract_strided_slice %3 {offsets = [0, 0], sizes = [16, 128], strides = [1, 1]} : vector<16x384xf32> to vector<16x128xf32>
    %cst_8 = arith.constant dense<0.000000e+00> : vector<16x128xf32>
    %7 = tpu.matmul %5, %6, %cst_8 {dimension_numbers = #tpu.dot_dimension_numbers<[1], [0], [0], [1], [0, 0, 1, 1], [], []>} : vector<16x16xf32>, vector<16x128xf32>, vector<16x128xf32> -> vector<16x128xf32>
    %c0_9 = arith.constant 0 : index
    %c1 = arith.constant 1 : index
    %c0_10 = arith.constant 0 : index
    %c0_11 = arith.constant 0 : index
    %8 = vector.load %arg2[%c0_9, %c1, %c0_10, %c0_11] : memref<1x3x16x16xf32, #tpu.memory_space<vmem>>, vector<1x1x16x16xf32>
    %9 = vector.shape_cast %8 : vector<1x1x16x16xf32> to vector<16x16xf32>
    %10 = vector.extract_strided_slice %3 {offsets = [0, 128], sizes = [16, 128], strides = [1, 1]} : vector<16x384xf32> to vector<16x128xf32>
    %cst_12 = arith.constant dense<0.000000e+00> : vector<16x128xf32>
    %11 = tpu.matmul %9, %10, %cst_12 {dimension_numbers = #tpu.dot_dimension_numbers<[1], [0], [0], [1], [0, 0, 1, 1], [], []>} : vector<16x16xf32>, vector<16x128xf32>, vector<16x128xf32> -> vector<16x128xf32>
    %12 = arith.addf %7, %11 : vector<16x128xf32>
    %c0_13 = arith.constant 0 : index
    %c2 = arith.constant 2 : index
    %c0_14 = arith.constant 0 : index
    %c0_15 = arith.constant 0 : index
    %13 = vector.load %arg2[%c0_13, %c2, %c0_14, %c0_15] : memref<1x3x16x16xf32, #tpu.memory_space<vmem>>, vector<1x1x16x16xf32>
    %14 = vector.shape_cast %13 : vector<1x1x16x16xf32> to vector<16x16xf32>
    %15 = vector.extract_strided_slice %3 {offsets = [0, 256], sizes = [16, 128], strides = [1, 1]} : vector<16x384xf32> to vector<16x128xf32>
    %cst_16 = arith.constant dense<0.000000e+00> : vector<16x128xf32>
    %16 = tpu.matmul %14, %15, %cst_16 {dimension_numbers = #tpu.dot_dimension_numbers<[1], [0], [0], [1], [0, 0, 1, 1], [], []>} : vector<16x16xf32>, vector<16x128xf32>, vector<16x128xf32> -> vector<16x128xf32>
    %17 = arith.addf %12, %16 : vector<16x128xf32>
    %cst_17 = arith.constant 0.000000e+00 : f32
    %18 = vector.broadcast %cst_17 : f32 to vector<16x128xf32>
    %19 = arith.maximumf %17, %18 : vector<16x128xf32>
    %c0_18 = arith.constant 0 : index
    %c0_19 = arith.constant 0 : index
    %c0_20 = arith.constant 0 : index
    %c0_21 = arith.constant 0 : index
    %20 = vector.load %arg2[%c0_18, %c0_19, %c0_20, %c0_21] : memref<1x3x16x16xf32, #tpu.memory_space<vmem>>, vector<1x1x16x16xf32>
    %21 = vector.shape_cast %20 : vector<1x1x16x16xf32> to vector<16x16xf32>
    %cst_22 = arith.constant dense<0.000000e+00> : vector<16x128xf32>
    %22 = tpu.matmul %21, %19, %cst_22 {dimension_numbers = #tpu.dot_dimension_numbers<[1], [0], [0], [1], [0, 0, 1, 1], [], []>} : vector<16x16xf32>, vector<16x128xf32>, vector<16x128xf32> -> vector<16x128xf32>
    %c0_23 = arith.constant 0 : index
    %c1_24 = arith.constant 1 : index
    %c0_25 = arith.constant 0 : index
    %c0_26 = arith.constant 0 : index
    %23 = vector.load %arg2[%c0_23, %c1_24, %c0_25, %c0_26] : memref<1x3x16x16xf32, #tpu.memory_space<vmem>>, vector<1x1x16x16xf32>
    %24 = vector.shape_cast %23 : vector<1x1x16x16xf32> to vector<16x16xf32>
    %cst_27 = arith.constant dense<0.000000e+00> : vector<16x128xf32>
    %25 = tpu.matmul %24, %19, %cst_27 {dimension_numbers = #tpu.dot_dimension_numbers<[1], [0], [0], [1], [0, 0, 1, 1], [], []>} : vector<16x16xf32>, vector<16x128xf32>, vector<16x128xf32> -> vector<16x128xf32>
    %c0_28 = arith.constant 0 : index
    %c2_29 = arith.constant 2 : index
    %c0_30 = arith.constant 0 : index
    %c0_31 = arith.constant 0 : index
    %26 = vector.load %arg2[%c0_28, %c2_29, %c0_30, %c0_31] : memref<1x3x16x16xf32, #tpu.memory_space<vmem>>, vector<1x1x16x16xf32>
    %27 = vector.shape_cast %26 : vector<1x1x16x16xf32> to vector<16x16xf32>
    %cst_32 = arith.constant dense<0.000000e+00> : vector<16x128xf32>
    %28 = tpu.matmul %27, %19, %cst_32 {dimension_numbers = #tpu.dot_dimension_numbers<[1], [0], [0], [1], [0, 0, 1, 1], [], []>} : vector<16x16xf32>, vector<16x128xf32>, vector<16x128xf32> -> vector<16x128xf32>
    %29 = tpu.concatenate %22, %25, %28 in 1 : vector<16x128xf32>, vector<16x128xf32>, vector<16x128xf32> -> vector<16x384xf32>
    %c0_33 = arith.constant 0 : index
    %c0_34 = arith.constant 0 : index
    %30 = vector.load %arg6[%c0_33, %c0_34] : memref<384x128xf32, #tpu.memory_space<vmem>>, vector<384x128xf32>
    %cst_35 = arith.constant dense<0.000000e+00> : vector<16x128xf32>
    %31 = tpu.matmul %29, %30, %cst_35 {dimension_numbers = #tpu.dot_dimension_numbers<[1], [0], [0], [1], [0, 0, 1, 1], [], []>} : vector<16x384xf32>, vector<384x128xf32>, vector<16x128xf32> -> vector<16x128xf32>
    %cst_36 = arith.constant 0.000000e+00 : f32
    %32 = vector.broadcast %cst_36 : f32 to vector<16x128xf32>
    %33 = arith.maximumf %31, %32 : vector<16x128xf32>
    %c0_37 = arith.constant 0 : index
    %c0_38 = arith.constant 0 : index
    %34 = vector.load %arg7[%c0_37, %c0_38] : memref<128x3xf32, #tpu.memory_space<vmem>>, vector<128x3xf32>
    %cst_39 = arith.constant dense<0.000000e+00> : vector<16x3xf32>
    %35 = tpu.matmul %33, %34, %cst_39 {dimension_numbers = #tpu.dot_dimension_numbers<[1], [0], [0], [1], [0, 0, 1, 1], [], []>} : vector<16x128xf32>, vector<128x3xf32>, vector<16x3xf32> -> vector<16x3xf32>
    %c0_40 = arith.constant 0 : index
    %c0_41 = arith.constant 0 : index
    %c0_42 = arith.constant 0 : index
    %36 = vector.load %arg3[%c0_40, %c0_41, %c0_42] : memref<1x32x16xf32, #tpu.memory_space<vmem>>, vector<1x32x16xf32>
    %37 = vector.shape_cast %36 : vector<1x32x16xf32> to vector<32x16xf32>
    %cst_43 = arith.constant dense<0.000000e+00> : vector<32x3xf32>
    %38 = tpu.matmul %37, %35, %cst_43 {dimension_numbers = #tpu.dot_dimension_numbers<[1], [0], [0], [1], [0, 0, 1, 1], [], []>} : vector<32x16xf32>, vector<16x3xf32>, vector<32x3xf32> -> vector<32x3xf32>
    %c0_44 = arith.constant 0 : index
    %c0_45 = arith.constant 0 : index
    %c0_46 = arith.constant 0 : index
    %39 = vector.load %arg4[%c0_44, %c0_45, %c0_46] : memref<1x32x3xf32, #tpu.memory_space<vmem>>, vector<1x32x3xf32>
    %40 = vector.shape_cast %39 : vector<1x32x3xf32> to vector<32x3xf32>
    %41 = arith.mulf %38, %40 : vector<32x3xf32>
    %cst_47 = arith.constant dense<0.000000e+00> : vector<32xf32>
    %42 = vector.multi_reduction <add>, %41, %cst_47 [1] : vector<32x3xf32> to vector<32xf32>
    %43 = vector.shape_cast %42 : vector<32xf32> to vector<32x1xf32>
    %44 = vector.shape_cast %43 : vector<32x1xf32> to vector<32x1xf32>
    %45 = vector.broadcast %44 : vector<32x1xf32> to vector<32x128xf32>
    %c0_48 = arith.constant 0 : index
    %c0_49 = arith.constant 0 : index
    %c0_50 = arith.constant 0 : index
    %46 = vector.load %arg8[%c0_48, %c0_49, %c0_50] : memref<1x32x128xf32, #tpu.memory_space<vmem>>, vector<1x32x128xf32>
    %47 = vector.shape_cast %46 : vector<1x32x128xf32> to vector<32x128xf32>
    %48 = vector.shape_cast %45 : vector<32x128xf32> to vector<1x32x128xf32>
    tpu.vector_store %arg8[%c0_48, %c0_49, %c0_50], %48 {strides = array<i32>} : memref<1x32x128xf32, #tpu.memory_space<vmem>>, vector<1x32x128xf32>,
    return
  }
  func.func @transform_0(%arg0: i32) -> (i32, i32, i32) {
    %c0_i32 = arith.constant 0 : i32
    %c0_i32_0 = arith.constant 0 : i32
    %c0_i32_1 = arith.constant 0 : i32
    return %arg0, %c0_i32, %c0_i32_0 : i32, i32, i32
  }
  func.func @transform_1(%arg0: i32) -> (i32, i32, i32, i32) {
    %c0_i32 = arith.constant 0 : i32
    %c0_i32_0 = arith.constant 0 : i32
    %c0_i32_1 = arith.constant 0 : i32
    %c0_i32_2 = arith.constant 0 : i32
    return %arg0, %c0_i32, %c0_i32_0, %c0_i32_1 : i32, i32, i32, i32
  }
  func.func @transform_2(%arg0: i32) -> (i32, i32, i32) {
    %c0_i32 = arith.constant 0 : i32
    %c0_i32_0 = arith.constant 0 : i32
    %c0_i32_1 = arith.constant 0 : i32
    return %arg0, %c0_i32, %c0_i32_0 : i32, i32, i32
  }
  func.func @transform_3(%arg0: i32) -> (i32, i32, i32) {
    %c0_i32 = arith.constant 0 : i32
    %c0_i32_0 = arith.constant 0 : i32
    %c0_i32_1 = arith.constant 0 : i32
    return %arg0, %c0_i32, %c0_i32_0 : i32, i32, i32
  }
  func.func @transform_4(%arg0: i32) -> (i32, i32) {
    %c0_i32 = arith.constant 0 : i32
    %c0_i32_0 = arith.constant 0 : i32
    %c0_i32_1 = arith.constant 0 : i32
    return %c0_i32, %c0_i32_0 : i32, i32
  }
  func.func @transform_5(%arg0: i32) -> (i32, i32) {
    %c0_i32 = arith.constant 0 : i32
    %c0_i32_0 = arith.constant 0 : i32
    %c0_i32_1 = arith.constant 0 : i32
    return %c0_i32, %c0_i32_0 : i32, i32
  }
  func.func @transform_6(%arg0: i32) -> (i32, i32) {
    %c0_i32 = arith.constant 0 : i32
    %c0_i32_0 = arith.constant 0 : i32
    %c0_i32_1 = arith.constant 0 : i32
    return %c0_i32, %c0_i32_0 : i32, i32
  }
  func.func @transform_7(%arg0: i32) -> (i32, i32, i32) {
    %c0_i32 = arith.constant 0 : i32
    %c0_i32_0 = arith.constant 0 : i32
    %c0_i32_1 = arith.constant 0 : i32
    return %arg0, %c0_i32, %c0_i32_0 : i32, i32, i32
  }
}

</mosaic_0001>

<bundles_post_ra>
// kernel: regression_x1_forward.1
= control target key start
LH: loop header
LB: loop body
LE: loop exit
PB: predicated region body
PF: predicated region fallthrough
CT: control target
= control target key end

     0   :  { %s1029_s24 = smov 0   ;;  %s1295_s0 = inlined_call_operand.vmem [shape: f32[4,16,4], index: 0, kind: input, shape index: {}]   ;;  %s1296_s1 = inlined_call_operand.vmem [shape: f32[4,3,16,16], index: 1, kind: input, shape index: {}]   ;;  %s1297_s2 = inlined_call_operand.vmem [shape: f32[4,32,16], index: 2, kind: input, shape index: {}]   ;;  %s1298_s3 = inlined_call_operand.vmem [shape: f32[4,32,3], index: 3, kind: input, shape index: {}]   ;;  %s1299_s4 = inlined_call_operand.vmem [shape: f32[4,384], index: 4, kind: input, shape index: {}]   ;;  %s1300_s5 = inlined_call_operand.vmem [shape: f32[384,128], index: 5, kind: input, shape index: {}]   ;;  %s1301_s6 = inlined_call_operand.vmem [shape: f32[128,3], index: 6, kind: input, shape index: {}]   ;;  %s1302_s7 = inlined_call_operand.vmem [shape: f32[4,32,128], index: 7, kind: output, shape index: {}]  }
   0x1 LB: > { %s922_s25 = sadd.s32 4294967295, %s987_s24   ;;  %p926_p0 = scmp.ge.s32.totalorder %s987_s24, 1  ;;  %s987_s24 = sphi %s1029_s24, %s17_s24  }
   0x2   : > { %p267_p1 = scmp.lt.s32.totalorder %s987_s24, 5 }
   0x4   : > { %p268_p2 = pnand %p926_p0, %p267_p1 }
   0x5   : > { %p314_p3 = scmp.lt.s32.totalorder (!%p268_p2), %s922_s25, 3 }
   0x6   : > { %271 = sbr.rel (%p268_p2) target bundleno = 989 (0x3dd), region = 48 }
   0xb   : > { %v341_v0 = vld [vmem:[%s1299_s4] sm:$0xff]  ;;  %v342_v1 = vld [vmem:[%s1299_s4 + $0x8] sm:$0xf]  ;;  %s1304_s25 = smov (!%p314_p3, %s922_s25), 3  ;;  %vm358_vm0 = vcmask 1043456   ;;  %vm351_vm1 = vcmask 31744  }
   0xc   : > { %345 = vst [vmem:[#allocation1] ss:$2 sm:$0xff] %v341_v0  ;;  %s967_s30 = sshll.u32 %s1304_s25, 4  ;;  %s972_s11 = smul.u32 48, %s1304_s25  ;;  %vm439_vm2 = vcmask 130048   ;;  %v618_v21 = vld [vmem:[%s1300_s5 + $0x78] sm:$0xff] }
   0xd   : > { %347 = vst [vmem:[#allocation1 + $0x10] ss:$2 sm:$0xff] %v342_v1  ;;  %s318_s10 = scalar_lea.vmem %s1295_s0, %s967_s30  ;;  %v617_v22 = vld [vmem:[%s1300_s5 + $0x70] sm:$0xff]  ;;  %v616_v23 = vld [vmem:[%s1300_s5 + $0x68] sm:$0xff]  ;;  %v615_v24 = vld [vmem:[%s1300_s5 + $0x60] sm:$0xff]  ;;  %s1270_s17 = sshll.u32 %s1304_s25, 5 }
   0xe   : > { %v339_v2 = vld [vmem:[%s318_s10] sm:$0xff]  ;;  %v340_v6 = vld [vmem:[%s318_s10 + $0x8] sm:$0xff]  ;;  %s323_s14 = scalar_lea.vmem %s1296_s1, %s972_s11  ;;  %v614_v26 = vld [vmem:[%s1300_s5 + $0x58] sm:$0xff]  ;;  %s328_s20 = scalar_lea.vmem %s1297_s2, %s1270_s17  ;;  %vm814_vm3 = vcmask 23552  }
   0xf   : > { %v434_v12 = vld [vmem:[%s323_s14] sm:$0xff]  ;;  %v945_v13 = vld [vmem:[%s323_s14 + $0x10] sm:$0xff]  ;;  %v1055_v16 = vld [vmem:[%s323_s14 + $0x8] sm:$0xff]  ;;  %s333_s22 = scalar_lea.vmem %s1298_s3, %s1270_s17  ;;  %s338_s27 = scalar_lea.vmem %s1302_s7, %s1270_s17 }
  0x10   : > { %v951_v15 = vld [vmem:[%s323_s14 + $0x20] sm:$0xff]  ;;  %v1057_v17 = vld [vmem:[%s323_s14 + $0x18] sm:$0xff]  ;;  %v1064_v18 = vld [vmem:[%s323_s14 + $0x28] sm:$0xff] }
  0x11   : > { %v613_v29 = vld [vmem:[%s1300_s5 + $0x50] sm:$0xff]  ;;  %v612_v30 = vld [vmem:[%s1300_s5 + $0x48] sm:$0xff]  ;;  %v611_v33 = vld [vmem:[%s1300_s5 + $0x40] sm:$0xff] }
  0x12   : > { %v610_v35 = vld [vmem:[%s1300_s5 + $0x38] sm:$0xff]  ;;  %v609_v39 = vld [vmem:[%s1300_s5 + $0x30] sm:$0xff]  ;;  %v608_v43 = vld [vmem:[%s1300_s5 + $0x28] sm:$0xff] }
  0x13   : > { %v349_v3 = vld.sshfl [vmem:[#allocation1 + $0x8] sm:$0xff pattern:$0x75316420]  ;;  %v348_v4 = vld.sshfl [vmem:[#allocation1] sm:$0xff pattern:$0x75316420] }
  0x14   : > { %939 = vmatpush.msk.msra.mxu1 %vm358_vm0, %v349_v3  ;;  %v350_v5 = vld.sshfl [vmem:[#allocation1 + $0x10] sm:$0xff pattern:$0x75316420]  ;;  %971 = vmatpush.msk.msra.mxu3 %vm358_vm0, %v348_v4  ;;  %v634_v41 = vld [vmem:[%s1300_s5 + $0xf8] sm:$0xff]  ;;  %v607_v46 = vld [vmem:[%s1300_s5 + $0x20] sm:$0xff] }
  0x15   : > { %942 = vmatpush.msk.msra.mxu2 %vm358_vm0, %v350_v5  ;;  %940 = vmatmul.msk.f32.vlgmr.msra.gmra.mxu1 %vm351_vm1, %v339_v2  ;;  %v650_v42 = vld [vmem:[%s1300_s5 + $0x178] sm:$0xff]  ;;  %v633_v44 = vld [vmem:[%s1300_s5 + $0xf0] sm:$0xff]  ;;  %v632_v47 = vld [vmem:[%s1300_s5 + $0xe8] sm:$0xff] }
  0x16   : > { %943 = vmatmul.msk.f32.vlgmr.msra.gmra.mxu2 %vm351_vm1, %v339_v2  ;;  %938 = vmatmul.msk.f32.vlgmr.msra.gmra.mxu3 %vm351_vm1, %v340_v6  ;;  %v649_v45 = vld [vmem:[%s1300_s5 + $0x170] sm:$0xff]  ;;  %v648_v48 = vld [vmem:[%s1300_s5 + $0x168] sm:$0xff]  ;;  %v631_v49 = vld [vmem:[%s1300_s5 + $0xe0] sm:$0xff] }
  0x17   : > { %936 = vmatpush.msk.msra.mxu0 %vm358_vm0, %v348_v4  ;;  %651 = vmatpush.msrb.mxu1 %v618_v21  ;;  %v630_v50 = vld [vmem:[%s1300_s5 + $0xd8] sm:$0xff]  ;;  %v647_v51 = vld [vmem:[%s1300_s5 + $0x160] sm:$0xff]  ;;  %v629_v52 = vld [vmem:[%s1300_s5 + $0xd0] sm:$0xff] }
  0x18   : > { %937 = vmatmul.msk.f32.vlgmr.msra.gmra.mxu0 %vm351_vm1, %v339_v2  ;;  %v646_v53 = vld [vmem:[%s1300_s5 + $0x158] sm:$0xff]  ;;  %v628_v54 = vld [vmem:[%s1300_s5 + $0xc8] sm:$0xff]  ;;  %v645_v55 = vld [vmem:[%s1300_s5 + $0x150] sm:$0xff] }
  0x19   : > { %652 = vmatpush.msrb.mxu1 %v617_v22  ;;  %v627_v56 = vld [vmem:[%s1300_s5 + $0xc0] sm:$0xff]  ;;  %v644_v57 = vld [vmem:[%s1300_s5 + $0x148] sm:$0xff]  ;;  %v626_v58 = vld [vmem:[%s1300_s5 + $0xb8] sm:$0xff] }
  0x1a   : > { %v643_v59 = vld [vmem:[%s1300_s5 + $0x140] sm:$0xff]  ;;  %v625_v60 = vld [vmem:[%s1300_s5 + $0xb0] sm:$0xff]  ;;  %v642_v61 = vld [vmem:[%s1300_s5 + $0x138] sm:$0xff] }
  0x1b   : > { %653 = vmatpush.msrb.mxu1 %v616_v23  ;;  %v624_v62 = vld [vmem:[%s1300_s5 + $0xa8] sm:$0xff]  ;;  %v641_v63 = vld [vmem:[%s1300_s5 + $0x130] sm:$0xff]  ;;  %v623_v0 = vld [vmem:[%s1300_s5 + $0xa0] sm:$0xff] }
  0x1c   : > { %v640_v1 = vld [vmem:[%s1300_s5 + $0x128] sm:$0xff]  ;;  %v622_v2 = vld [vmem:[%s1300_s5 + $0x98] sm:$0xff]  ;;  %v639_v3 = vld [vmem:[%s1300_s5 + $0x120] sm:$0xff] }
  0x1d   : > { %941 = vmatmul.msk.f32.gmra.mxu1 %vm351_vm1, %v340_v6  ;;  %v621_v4 = vld [vmem:[%s1300_s5 + $0x90] sm:$0xff]  ;;  %v638_v5 = vld [vmem:[%s1300_s5 + $0x118] sm:$0xff]  ;;  %v731_v21 = vld [vmem:[%s1301_s6 + $0x48] sm:$0xff] }
  0x1e   : > { %944 = vmatmul.msk.f32.gmra.mxu2 %vm351_vm1, %v340_v6  ;;  %654 = vmatpush.msrb.mxu1 %v615_v24  ;;  %v620_v6 = vld [vmem:[%s1300_s5 + $0x88] sm:$0xff]  ;;  %v730_v22 = vld [vmem:[%s1301_s6 + $0x40] sm:$0xff]  ;;  %v729_v23 = vld [vmem:[%s1301_s6 + $0x38] sm:$0xff] }
  0x1f   : > { %v728_v24 = vld [vmem:[%s1301_s6 + $0x30] sm:$0xff] }
  0x20   : > { %655 = vmatpush.msrb.mxu1 %v614_v26  ;;  %v727_v26 = vld [vmem:[%s1301_s6 + $0x28] sm:$0xff] }
  0x22   : > { %656 = vmatpush.msrb.mxu1 %v613_v29 }
  0x24   : > { %657 = vmatpush.msrb.mxu1 %v612_v30 }
  0x26   : > { %658 = vmatpush.msrb.mxu1 %v611_v33  ;;  %v725_v33 = vld [vmem:[%s1301_s6 + $0x18] sm:$0xff] }
  0x28   : > { %659 = vmatpush.msrb.mxu1 %v610_v35  ;;  %v723_v35 = vld [vmem:[%s1301_s6 + $0x8] sm:$0xff] }
  0x2a   : > { %660 = vmatpush.msrb.mxu1 %v609_v39 }
  0x2c   : > { %661 = vmatpush.msrb.mxu1 %v608_v43 }
  0x2e   : > { %662 = vmatpush.msrb.mxu1 %v607_v46 }
  0x92   : > { %v405_v7 = vpop.f32.mrf.mxu1 }
  0x95   : > { %v382_v8 = vpop.f32.mrf.mxu0 }
  0x99   : > { %v428_v9 = vpop.f32.mrf.mxu2  ;;  %v385_v10 = vpop.f32.mrf.mxu3 }
  0x9a   : > { %v408_v11 = vpop.f32.mrf.mxu1  ;;  %489 = vmatpush.msrb.mxu0 %v385_v10  ;;  %v636_v10 = vld [vmem:[%s1300_s5 + $0x108] sm:$0xff] }
  0x9b   : > { %460 = vmatpush.msrb.mxu3 %v408_v11  ;;  %v605_v11 = vld [vmem:[%s1300_s5 + $0x10] sm:$0xff] }
  0x9c   : > { %490 = vmatpush.msrb.mxu0 %v382_v8  ;;  %v606_v8 = vld [vmem:[%s1300_s5 + $0x18] sm:$0xff] }
  0x9d   : > { %461 = vmatpush.msrb.mxu3 %v405_v7  ;;  %949 = vmatmul.msk.f32.vlgmr.msrb.gmra.mxu0 %vm439_vm2, %v434_v12  ;;  %v637_v7 = vld [vmem:[%s1300_s5 + $0x110] sm:$0xff] }
  0x9e   : > { %947 = vmatmul.msk.f32.vlgmr.msrb.gmra.mxu3 %vm439_vm2, %v945_v13  ;;  %663 = vmatpush.msrb.mxu1 %v606_v8 }
  0xa0   : > { %664 = vmatpush.msrb.mxu1 %v605_v11 }
  0xa1   : > { %v431_v14 = vpop.f32.mrf.mxu2 }
  0xa2   : > { %521 = vmatpush.msrb.mxu2 %v431_v14  ;;  %v603_v14 = vld [vmem:[%s1300_s5] sm:$0xff] }
  0xa4   : > { %522 = vmatpush.msrb.mxu2 %v428_v9  ;;  %v619_v9 = vld [vmem:[%s1300_s5 + $0x80] sm:$0xff] }
  0xa5   : > { %953 = vmatmul.msk.f32.vlgmr.msrb.gmra.mxu2 %vm439_vm2, %v951_v15  ;;  %950 = vmatmul.msk.f32.gmra.mxu0 %vm439_vm2, %v1055_v16 }
  0xa6   : > { %948 = vmatmul.msk.f32.gmra.mxu3 %vm439_vm2, %v1057_v17 }
  0xad   : > { %954 = vmatmul.msk.f32.gmra.mxu2 %vm439_vm2, %v1064_v18 }
 0x11a   : > { %v492_v19 = vpop.f32.mrf.mxu0 }
 0x121   : > { %v463_v20 = vpop.f32.mrf.mxu3 }
 0x122   : > { %v495_v28 = vpop.f32.mrf.mxu0  ;;  %v493_v31 = vadd.f32 %v492_v19, %v463_v20  ;;  %v733_v19 = vld [vmem:[%s1301_s6 + $0x58] sm:$0xff]  ;;  %v732_v20 = vld [vmem:[%s1301_s6 + $0x50] sm:$0xff] }
 0x128   : > { %v524_v25 = vpop.f32.mrf.mxu2 }
 0x129   : > { %v466_v27 = vpop.f32.mrf.mxu3  ;;  %v530_v36 = vadd.f32 %v524_v25, %v493_v31 }
 0x12a   : > { %v496_v32 = vadd.f32 %v495_v28, %v466_v27  ;;  %v726_v27 = vld [vmem:[%s1301_s6 + $0x20] sm:$0xff] }
 0x12b   : > { %v532_v40 = vmax.f32 %v530_v36, 0.0  ;;  %v722_v36 = vld [vmem:[%s1301_s6] sm:$0xff] }
 0x130   : > { %v527_v34 = vpop.f32.mrf.mxu2 }
 0x131   : > { %v531_v37 = vadd.f32 %v527_v34, %v496_v32  ;;  %v724_v34 = vld [vmem:[%s1301_s6 + $0x10] sm:$0xff] }
 0x133   : > { %v533_v38 = vmax.f32 %v531_v37, 0.0 }
 0x135   : > { %548 = vmatpush.msra.mxu2 %v533_v38  ;;  %571 = vmatpush.msra.mxu3 %v533_v38 }
 0x136   : > { %594 = vmatpush.msra.mxu0 %v533_v38 }
 0x137   : > { %549 = vmatpush.msra.mxu2 %v532_v40  ;;  %572 = vmatpush.msra.mxu3 %v532_v40 }
 0x138   : > { %595 = vmatpush.msra.mxu0 %v532_v40  ;;  %957 = vmatmul.msk.f32.vlgmr.msra.gmra.mxu3 %vm439_vm2, %v945_v13  ;;  %v604_v13 = vld [vmem:[%s1300_s5 + $0x8] sm:$0xff] }
 0x139   : > { %955 = vmatmul.msk.f32.vlgmr.msra.gmra.mxu2 %vm439_vm2, %v434_v12  ;;  %959 = vmatmul.msk.f32.vlgmr.msra.gmra.mxu0 %vm439_vm2, %v951_v15  ;;  %v635_v12 = vld [vmem:[%s1300_s5 + $0x100] sm:$0xff]  ;;  %v737_v15 = vld [vmem:[%s1301_s6 + $0x78] sm:$0xff] }
 0x13a   : > { %674 = vmatpush.msrb.mxu2 %v634_v41  ;;  %697 = vmatpush.msrb.mxu3 %v650_v42 }
 0x13b   : > { %665 = vmatpush.msrb.mxu1 %v604_v13  ;;  %738 = vmatpush.msrb.mxu0 %v737_v15 }
 0x13c   : > { %675 = vmatpush.msrb.mxu2 %v633_v44  ;;  %698 = vmatpush.msrb.mxu3 %v649_v45 }
 0x13d   : > { %666 = vmatpush.msrb.mxu1 %v603_v14 }
 0x13e   : > { %676 = vmatpush.msrb.mxu2 %v632_v47  ;;  %699 = vmatpush.msrb.mxu3 %v648_v48 }
 0x140   : > { %958 = vmatmul.msk.f32.gmra.mxu3 %vm439_vm2, %v1057_v17  ;;  %677 = vmatpush.msrb.mxu2 %v631_v49  ;;  %v735_v17 = vld [vmem:[%s1301_s6 + $0x68] sm:$0xff] }
 0x141   : > { %956 = vmatmul.msk.f32.gmra.mxu2 %vm439_vm2, %v1055_v16  ;;  %960 = vmatmul.msk.f32.gmra.mxu0 %vm439_vm2, %v1064_v18  ;;  %v736_v16 = vld [vmem:[%s1301_s6 + $0x70] sm:$0xff]  ;;  %v734_v18 = vld [vmem:[%s1301_s6 + $0x60] sm:$0xff] }
 0x142   : > { %678 = vmatpush.msrb.mxu2 %v630_v50  ;;  %700 = vmatpush.msrb.mxu3 %v647_v51  ;;  %v761_v51 = vld [vmem:[%s328_s20] sm:$0xff] }
 0x143   : > { %739 = vmatpush.msrb.mxu0 %v736_v16 }
 0x144   : > { %679 = vmatpush.msrb.mxu2 %v629_v52  ;;  %701 = vmatpush.msrb.mxu3 %v646_v53  ;;  %v762_v52 = vld [vmem:[%s328_s20 + $0x8] sm:$0xff]  ;;  %v763_v53 = vld [vmem:[%s328_s20 + $0x10] sm:$0xff] }
 0x145   : > { %740 = vmatpush.msrb.mxu0 %v735_v17 }
 0x146   : > { %680 = vmatpush.msrb.mxu2 %v628_v54  ;;  %702 = vmatpush.msrb.mxu3 %v645_v55  ;;  %v764_v54 = vld [vmem:[%s328_s20 + $0x18] sm:$0xff]  ;;  %v806_v55 = vld [vmem:[%s333_s22] sm:$0xff] }
 0x147   : > { %741 = vmatpush.msrb.mxu0 %v734_v18 }
 0x148   : > { %681 = vmatpush.msrb.mxu2 %v627_v56  ;;  %703 = vmatpush.msrb.mxu3 %v644_v57 }
 0x149   : > { %742 = vmatpush.msrb.mxu0 %v733_v19 }
 0x14a   : > { %682 = vmatpush.msrb.mxu2 %v626_v58  ;;  %704 = vmatpush.msrb.mxu3 %v643_v59  ;;  %v807_v59 = vld [vmem:[%s333_s22 + $0x8] sm:$0xff] }
 0x14b   : > { %743 = vmatpush.msrb.mxu0 %v732_v20 }
 0x14c   : > { %683 = vmatpush.msrb.mxu2 %v625_v60  ;;  %705 = vmatpush.msrb.mxu3 %v642_v61 }
 0x14d   : > { %744 = vmatpush.msrb.mxu0 %v731_v21 }
 0x14e   : > { %684 = vmatpush.msrb.mxu2 %v624_v62  ;;  %706 = vmatpush.msrb.mxu3 %v641_v63  ;;  %v808_v63 = vld [vmem:[%s333_s22 + $0x10] sm:$0xff] }
 0x14f   : > { %745 = vmatpush.msrb.mxu0 %v730_v22 }
 0x150   : > { %685 = vmatpush.msrb.mxu2 %v623_v0  ;;  %707 = vmatpush.msrb.mxu3 %v640_v1 }
 0x151   : > { %746 = vmatpush.msrb.mxu0 %v729_v23 }
 0x152   : > { %686 = vmatpush.msrb.mxu2 %v622_v2  ;;  %708 = vmatpush.msrb.mxu3 %v639_v3  ;;  %v809_v3 = vld [vmem:[%s333_s22 + $0x18] sm:$0xff] }
 0x153   : > { %747 = vmatpush.msrb.mxu0 %v728_v24 }
 0x154   : > { %687 = vmatpush.msrb.mxu2 %v621_v4  ;;  %709 = vmatpush.msrb.mxu3 %v638_v5 }
 0x155   : > { %748 = vmatpush.msrb.mxu0 %v727_v26 }
 0x156   : > { %688 = vmatpush.msrb.mxu2 %v620_v6  ;;  %710 = vmatpush.msrb.mxu3 %v637_v7 }
 0x157   : > { %749 = vmatpush.msrb.mxu0 %v726_v27 }
 0x158   : > { %689 = vmatpush.msrb.mxu2 %v619_v9  ;;  %711 = vmatpush.msrb.mxu3 %v636_v10 }
 0x159   : > { %750 = vmatpush.msrb.mxu0 %v725_v33 }
 0x15a   : > { %712 = vmatpush.msrb.mxu3 %v635_v12 }
 0x15b   : > { %751 = vmatpush.msrb.mxu0 %v724_v34 }
 0x15d   : > { %752 = vmatpush.msrb.mxu0 %v723_v35 }
 0x15f   : > { %753 = vmatpush.msrb.mxu0 %v722_v36 }
 0x1b6   : > { %v597_v25 = vpop.f32.mrf.mxu0 }
 0x1b7   : > { %713 = vmatmul.f32.vlgmr.msrb.gmra.mxu3 %v597_v25 }
 0x1bb   : > { %v574_v28 = vpop.f32.mrf.mxu3 }
 0x1bc   : > { %690 = vmatmul.f32.vlgmr.msrb.gmra.mxu2 %v574_v28  ;;  %v551_v29 = vpop.f32.mrf.mxu2 }
 0x1bd   : > { %667 = vmatmul.f32.vlgmr.msrb.gmra.mxu1 %v551_v29 }
 0x1be   : > { %v600_v30 = vpop.f32.mrf.mxu0 }
 0x1bf   : > { %716 = vmatmul.f32.gmra.mxu3 %v600_v30 }
 0x1c3   : > { %v577_v31 = vpop.f32.mrf.mxu3 }
 0x1c4   : > { %693 = vmatmul.f32.gmra.mxu2 %v577_v31  ;;  %v554_v32 = vpop.f32.mrf.mxu2 }
 0x1c5   : > { %670 = vmatmul.f32.gmra.mxu1 %v554_v32 }
 0x23a   : > { %v668_v37 = vpop.f32.mrf.mxu1  ;;  %v714_v38 = vpop.f32.mrf.mxu3 }
 0x23f   : > { %v691_v39 = vpop.f32.mrf.mxu2 }
 0x240   : > { %v692_v40 = vadd.f32 %v691_v39, %v668_v37 }
 0x242   : > { %v715_v41 = vadd.f32 %v714_v38, %v692_v40  ;;  %v671_v43 = vpop.f32.mrf.mxu1  ;;  %v717_v45 = vpop.f32.mrf.mxu3 }
 0x244   : > { %v720_v42 = vmax.f32 %v715_v41, 0.0 }
 0x246   : > { %754 = vmatmul.f32.vlgmr.msrb.gmra.mxu0 %v720_v42 }
 0x247   : > { %v694_v44 = vpop.f32.mrf.mxu2 }
 0x248   : > { %v695_v46 = vadd.f32 %v694_v44, %v671_v43 }
 0x24a   : > { %v718_v47 = vadd.f32 %v717_v45, %v695_v46 }
 0x24c   : > { %v721_v48 = vmax.f32 %v718_v47, 0.0 }
 0x24e   : > { %757 = vmatmul.f32.gmra.mxu0 %v721_v48 }
 0x2c3   : > { %v755_v49 = vpop.f32.mrf.mxu0 }
 0x2cb   : > { %v758_v50 = vpop.f32.mrf.mxu0 }
 0x2cc   : > { %791 = vmatpush.msra.mxu1 %v758_v50 }
 0x2ce   : > { %792 = vmatpush.msra.mxu1 %v755_v49 }
 0x2cf   : > { %961 = vmatmul.msk.f32.vlgmr.msra.gmra.mxu1 %vm439_vm2, %v761_v51 }
 0x2d7   : > { %962 = vmatmul.msk.f32.gmra.mxu1 %vm439_vm2, %v762_v52 }
 0x2df   : > { %963 = vmatmul.msk.f32.gmra.mxu1 %vm439_vm2, %v763_v53 }
 0x2e7   : > { %964 = vmatmul.msk.f32.gmra.mxu1 %vm439_vm2, %v764_v54 }
 0x34c   : > { %v794_v56 = vpop.f32.mrf.mxu1 }
 0x34d   : > { %v810_v57 = vmul.f32 %v806_v55, %v794_v56 }
 0x34f   : > { %v815_v58 = vsel %vm814_vm3, %v810_v57, 0.0 }
 0x350   : > { %816 = vadd.xlane.f32.xlu0 %v815_v58 }
 0x354   : > { %v797_v60 = vpop.f32.mrf.mxu1 }
 0x355   : > { %v811_v61 = vmul.f32 %v807_v59, %v797_v60 }
 0x357   : > { %v818_v62 = vsel %vm814_vm3, %v811_v61, 0.0 }
 0x358   : > { %819 = vadd.xlane.f32.xlu0 %v818_v62 }
 0x35c   : > { %v800_v0 = vpop.f32.mrf.mxu1 }
 0x35d   : > { %v812_v1 = vmul.f32 %v808_v63, %v800_v0 }
 0x35f   : > { %v821_v2 = vsel %vm814_vm3, %v812_v1, 0.0 }
 0x360   : > { %822 = vadd.xlane.f32.xlu1 %v821_v2 }
 0x364   : > { %v803_v4 = vpop.f32.mrf.mxu1 }
 0x365   : > { %v813_v5 = vmul.f32 %v809_v3, %v803_v4 }
 0x367   : > { %v824_v6 = vsel %vm814_vm3, %v813_v5, 0.0 }
 0x368   : > { %825 = vadd.xlane.f32.xlu1 %v824_v6 }
 0x3c3   : > { %v817_v7 = vpop.xlane.xlu0 %816 }
 0x3c4   : > { %827 = vst [vmem:[%s338_s27] sm:$0xff] %v817_v7 }
 0x3cb   : > { %v820_v8 = vpop.xlane.xlu0 %819 }
 0x3cc   : > { %828 = vst [vmem:[%s338_s27 + $0x8] sm:$0xff] %v820_v8 }
 0x3d3   : > { %v823_v9 = vpop.xlane.xlu1 %822 }
 0x3d4   : > { %829 = vst [vmem:[%s338_s27 + $0x10] sm:$0xff] %v823_v9 }
 0x3db   : > { %v826_v10 = vpop.xlane.xlu1 %825 }
 0x3dc   : > { %830 = vst [vmem:[%s338_s27 + $0x18] sm:$0xff] %v826_v10 }
 0x3dd PF: > { %s17_s24 = sadd.s32 1, %s987_s24  }
 0x3de   : > { %p14_p4 = scmp.ge.s32.totalorder %s17_s24, 6  }
 0x3e0   :  { %16 = sbr.rel (!%p14_p4) target bundleno = 1 (0x1), region = 90 }

</bundles_post_ra>
